<compile_context>
chip_gen: v7x
topology: tpu7x:2x2x1
jax: 0.10.0
libtpu: 0.0.40
codegen_flags: <defaults>
</compile_context>

<pallas_src>
import functools

import jax
import jax.numpy as jnp
import numpy as np
from jax import lax
from jax.experimental import pallas as pl
from jax.experimental.pallas import tpu as pltpu

N_BINS = 15
N_BINS_PAD = 16  # pad the bin axis to 16 lanes; the extra bin can never be hit

# Same boundaries as torch.linspace(0, 1, n_bins + 1) in float32.
_BOUNDS = np.linspace(0.0, 1.0, N_BINS + 1, dtype=np.float32)
# (2, 16): row 0 = lowers, row 1 = uppers; pad bin uses (2, 2) -> never active.
_BOUNDS_PAD = np.stack(
    [np.append(_BOUNDS[:-1], np.float32(2.0)),
     np.append(_BOUNDS[1:], np.float32(2.0))]
).astype(np.float32)


def _ece_partial_kernel(softmax_ref, labels_ref, bounds_ref, out_ref):
    """Per-tile partial ECE statistics.

    softmax_ref: (TILE_N, C) float VMEM tile (softmax probabilities)
    labels_ref : (TILE_N, 1) int32 VMEM tile (-1 for padded rows)
    bounds_ref : (2, 16) float32 bin boundaries (row 0 lowers, row 1 uppers)
    out_ref    : (1, 3, 16) float32 per-bin [count, sum_conf, sum_acc]
    """
    s = softmax_ref[...]                                   # (TILE_N, C)
    lab = labels_ref[...]                                  # (TILE_N, 1) i32
    tn, c = s.shape

    # confidences, predictions = torch.max(softmaxes, 1)
    conf_native = jnp.max(s, axis=1, keepdims=True)        # (TILE_N, 1)
    ids = lax.broadcasted_iota(jnp.int32, (tn, c), 1)
    masked_ids = jnp.where(s == conf_native, ids, jnp.int32(c))
    pred = jnp.min(masked_ids, axis=1, keepdims=True)      # first-max argmax
    conf = conf_native.astype(jnp.float32)                 # (TILE_N, 1) f32

    # accuracies = predictions.eq(labels)
    acc = (pred == lab).astype(jnp.float32)                # (TILE_N, 1) f32

    # Single-pass binning: build the one-hot membership mask once, replacing
    # the 15 separate mask + reduce passes over conf/acc.
    bounds = bounds_ref[...]                               # (2, 16) f32
    lowers = bounds[0:1, :]                                # (1, 16)
    uppers = bounds[1:2, :]                                # (1, 16)
    in_bin = jnp.logical_and(conf > lowers, conf <= uppers).astype(jnp.float32)

    counts = jnp.sum(in_bin, axis=0, keepdims=True)              # (1, 16)
    sum_conf = jnp.sum(in_bin * conf, axis=0, keepdims=True)     # (1, 16)
    sum_acc = jnp.sum(in_bin * acc, axis=0, keepdims=True)       # (1, 16)

    stats = jnp.concatenate([counts, sum_conf, sum_acc], axis=0)  # (3, 16)
    out_ref[...] = stats.reshape(1, 3, N_BINS_PAD)


@functools.partial(jax.jit, static_argnames=("tile_n",))
def ece_loss(softmaxes, labels, *, tile_n=512):
    """softmaxes: (N, C) float probabilities; labels: (N,) ints. Returns (1,) f32."""
    n, c = softmaxes.shape

    # Tile over the batch axis; keep the tile a multiple of 8 sublanes and no
    # larger than the (rounded-up) batch itself.
    tile_n = int(min(tile_n, pl.cdiv(n, 8) * 8))
    tile_n = max(8, (tile_n // 8) * 8)
    num_tiles = int(pl.cdiv(n, tile_n))
    n_pad = num_tiles * tile_n

    labels2d = labels.reshape(n, 1).astype(jnp.int32)
    if n_pad > n:
        # Zero-probability rows -> conf == 0 -> fall in no bin; label -1 can
        # never match a prediction.  Normalization below uses the true N.
        softmaxes = jnp.pad(softmaxes, ((0, n_pad - n), (0, 0)))
        labels2d = jnp.pad(labels2d, ((0, n_pad - n), (0, 0)), constant_values=-1)

    bounds = jnp.asarray(_BOUNDS_PAD)                      # (2, 16) f32

    # Double-buffered softmax blocks + lane-padded (TILE_N,1) i32 label block
    # + slack for in-kernel temporaries; floor at the 32 MiB default, cap
    # below v7x's 64 MiB physical VMEM.
    in_bytes = 2 * tile_n * c * softmaxes.dtype.itemsize
    lab_bytes = 2 * tile_n * 128 * 4
    vmem_limit = int(min(max(in_bytes + lab_bytes + (8 << 20), 32 << 20), 64 << 20))

    partials = pl.pallas_call(
        _ece_partial_kernel,
        out_shape=jax.ShapeDtypeStruct((num_tiles, 3, N_BINS_PAD), jnp.float32),
        grid=(num_tiles,),
        in_specs=[
            pl.BlockSpec((tile_n, c), lambda i: (i, 0)),
            pl.BlockSpec((tile_n, 1), lambda i: (i, 0)),
            pl.BlockSpec((2, N_BINS_PAD), lambda i: (0, 0)),
        ],
        out_specs=pl.BlockSpec((1, 3, N_BINS_PAD), lambda i: (i, 0, 0)),
        compiler_params=pltpu.CompilerParams(
            dimension_semantics=("parallel",),
            vmem_limit_bytes=vmem_limit,
        ),
    )(softmaxes, labels2d, bounds)

    # Tiny finalize on the (num_tiles, 3, 16) partial sums.
    totals = jnp.sum(partials, axis=0)                     # (3, 16)
    counts, sum_conf, sum_acc = totals[0], totals[1], totals[2]

    prop_in_bin = counts / jnp.float32(n)                  # true batch size
    safe = jnp.maximum(counts, jnp.float32(1.0))
    gap = jnp.abs(sum_conf / safe - sum_acc / safe)
    ece = jnp.sum(jnp.where(counts > 0.0, gap * prop_in_bin, jnp.float32(0.0)))
    return ece.reshape(1)


def _ece_reference(softmaxes, labels):
    """Pure numpy reference mirroring the PyTorch forward."""
    s = np.asarray(softmaxes, dtype=np.float32)
    lab = np.asarray(labels, dtype=np.int64)
    conf = s.max(axis=1)
    pred = s.argmax(axis=1)
    acc = (pred == lab).astype(np.float32)
    ece = np.zeros(1, dtype=np.float32)
    for lo, hi in zip(_BOUNDS[:-1], _BOUNDS[1:]):
        in_bin = (conf > lo) & (conf <= hi)
        prop = in_bin.mean()
        if prop > 0:
            ece += np.abs(conf[in_bin].mean() - acc[in_bin].mean()) * prop
    return ece


if __name__ == "__main__":
    key = jax.random.PRNGKey(0)
    k1, k2, k3, k4 = jax.random.split(key, 4)

    # Test 1: small batch, single tile, no padding.
    batch, num_classes = 64, 16
    logits = jax.random.normal(k1, (batch, num_classes), dtype=jnp.float32) * 3.0
    softmaxes = jax.nn.softmax(logits, axis=1)
    labels = jax.random.randint(k2, (batch,), 0, num_classes, dtype=jnp.int32)
    out = jax.block_until_ready(ece_loss(softmaxes, labels))
    ref = _ece_reference(np.asarray(softmaxes), np.asarray(labels))
    assert out.shape == (1,)
    assert np.allclose(np.asarray(out), ref, atol=1e-5), (out, ref)

    # Test 2: multiple tiles plus a zero-padded final tile.
    batch2, num_classes2 = 300, 10
    logits2 = jax.random.normal(k3, (batch2, num_classes2), dtype=jnp.float32) * 2.0
    softmaxes2 = jax.nn.softmax(logits2, axis=1)
    labels2 = jax.random.randint(k4, (batch2,), 0, num_classes2, dtype=jnp.int32)
    out2 = jax.block_until_ready(ece_loss(softmaxes2, labels2, tile_n=128))
    ref2 = _ece_reference(np.asarray(softmaxes2), np.asarray(labels2))
    assert np.allclose(np.asarray(out2), ref2, atol=1e-5), (out2, ref2)

    print("KERNEL_OK")
</pallas_src>

<mosaic_0001>
module attributes {stable_mosaic.version = 11 : i64} {
  func.func @_ece_partial_kernel(%arg0: i32, %arg1: memref<64x16xf32, #tpu.memory_space<vmem>>, %arg2: memref<64x1xi32, #tpu.memory_space<vmem>>, %arg3: memref<2x16xf32, #tpu.memory_space<vmem>>, %arg4: memref<1x3x16xf32, #tpu.memory_space<vmem>>) attributes {dimension_semantics = [#tpu.dimension_semantics<parallel>], iteration_bounds = array<i64: 1>, scalar_prefetch = 0 : i64, scratch_operands = 0 : i64, tpu.core_type = #tpu.core_type<tc>, window_params = [{transform_indices = @transform_0, window_bounds = array<i64: 64, 16>}, {transform_indices = @transform_1, window_bounds = array<i64: 64, 1>}, {pipeline_mode = #tpu.pipeline_mode<synchronous>, transform_indices = @transform_2, window_bounds = array<i64: 2, 16>}, {transform_indices = @transform_3, window_bounds = array<i64: 1, 3, 16>}]} {
    %c0 = arith.constant 0 : index
    %c0_0 = arith.constant 0 : index
    %0 = vector.load %arg1[%c0, %c0_0] : memref<64x16xf32, #tpu.memory_space<vmem>>, vector<64x16xf32>
    %c0_1 = arith.constant 0 : index
    %c0_2 = arith.constant 0 : index
    %1 = vector.load %arg2[%c0_1, %c0_2] : memref<64x1xi32, #tpu.memory_space<vmem>>, vector<64x1xi32>
    %cst = arith.constant dense<0xFF800000> : vector<64xf32>
    %2 = vector.multi_reduction <maximumf>, %0, %cst [1] : vector<64x16xf32> to vector<64xf32>
    %3 = vector.shape_cast %2 : vector<64xf32> to vector<64x1xf32>
    %4 = tpu.iota {dimensions = array<i32: 1>} : vector<64x16xi32>
    %5 = vector.broadcast %3 : vector<64x1xf32> to vector<64x16xf32>
    %6 = arith.cmpf oeq, %0, %5 : vector<64x16xf32>
    %c16_i32 = arith.constant 16 : i32
    %7 = vector.broadcast %c16_i32 : i32 to vector<64x16xi32>
    %8 = arith.select %6, %4, %7 : vector<64x16xi1>, vector<64x16xi32>
    %cst_3 = arith.constant dense<2147483647> : vector<64xi32>
    %9 = vector.multi_reduction <minsi>, %8, %cst_3 [1] : vector<64x16xi32> to vector<64xi32>
    %10 = vector.shape_cast %9 : vector<64xi32> to vector<64x1xi32>
    %11 = arith.cmpi eq, %10, %1 : vector<64x1xi32>
    %12 = arith.extui %11 : vector<64x1xi1> to vector<64x1xi32>
    %13 = arith.sitofp %12 : vector<64x1xi32> to vector<64x1xf32>
    %c0_4 = arith.constant 0 : index
    %c0_5 = arith.constant 0 : index
    %14 = vector.load %arg3[%c0_4, %c0_5] : memref<2x16xf32, #tpu.memory_space<vmem>>, vector<2x16xf32>
    %15 = vector.extract_strided_slice %14 {offsets = [0, 0], sizes = [1, 16], strides = [1, 1]} : vector<2x16xf32> to vector<1x16xf32>
    %16 = vector.extract_strided_slice %14 {offsets = [1, 0], sizes = [1, 16], strides = [1, 1]} : vector<2x16xf32> to vector<1x16xf32>
    %17 = vector.broadcast %3 : vector<64x1xf32> to vector<64x16xf32>
    %18 = vector.broadcast %15 : vector<1x16xf32> to vector<64x16xf32>
    %19 = arith.cmpf ogt, %17, %18 : vector<64x16xf32>
    %20 = vector.broadcast %3 : vector<64x1xf32> to vector<64x16xf32>
    %21 = vector.broadcast %16 : vector<1x16xf32> to vector<64x16xf32>
    %22 = arith.cmpf ole, %20, %21 : vector<64x16xf32>
    %23 = arith.andi %19, %22 : vector<64x16xi1>
    %24 = arith.extui %23 : vector<64x16xi1> to vector<64x16xi32>
    %25 = arith.sitofp %24 : vector<64x16xi32> to vector<64x16xf32>
    %cst_6 = arith.constant dense<0.000000e+00> : vector<16xf32>
    %26 = vector.multi_reduction <add>, %25, %cst_6 [0] : vector<64x16xf32> to vector<16xf32>
    %27 = vector.shape_cast %26 : vector<16xf32> to vector<1x16xf32>
    %28 = vector.broadcast %3 : vector<64x1xf32> to vector<64x16xf32>
    %29 = arith.mulf %25, %28 : vector<64x16xf32>
    %cst_7 = arith.constant dense<0.000000e+00> : vector<16xf32>
    %30 = vector.multi_reduction <add>, %29, %cst_7 [0] : vector<64x16xf32> to vector<16xf32>
    %31 = vector.shape_cast %30 : vector<16xf32> to vector<1x16xf32>
    %32 = vector.broadcast %13 : vector<64x1xf32> to vector<64x16xf32>
    %33 = arith.mulf %25, %32 : vector<64x16xf32>
    %cst_8 = arith.constant dense<0.000000e+00> : vector<16xf32>
    %34 = vector.multi_reduction <add>, %33, %cst_8 [0] : vector<64x16xf32> to vector<16xf32>
    %35 = vector.shape_cast %34 : vector<16xf32> to vector<1x16xf32>
    %36 = tpu.concatenate %27, %31, %35 in 0 : vector<1x16xf32>, vector<1x16xf32>, vector<1x16xf32> -> vector<3x16xf32>
    %37 = vector.shape_cast %36 : vector<3x16xf32> to vector<1x3x16xf32>
    %c0_9 = arith.constant 0 : index
    %c0_10 = arith.constant 0 : index
    %c0_11 = arith.constant 0 : index
    %38 = vector.load %arg4[%c0_9, %c0_10, %c0_11] : memref<1x3x16xf32, #tpu.memory_space<vmem>>, vector<1x3x16xf32>
    tpu.vector_store %arg4[%c0_9, %c0_10, %c0_11], %37 {strides = array<i32>} : memref<1x3x16xf32, #tpu.memory_space<vmem>>, vector<1x3x16xf32>,
    return
  }
  func.func @transform_0(%arg0: i32) -> (i32, i32) {
    %c0_i32 = arith.constant 0 : i32
    %c0_i32_0 = arith.constant 0 : i32
    return %arg0, %c0_i32 : i32, i32
  }
  func.func @transform_1(%arg0: i32) -> (i32, i32) {
    %c0_i32 = arith.constant 0 : i32
    %c0_i32_0 = arith.constant 0 : i32
    return %arg0, %c0_i32 : i32, i32
  }
  func.func @transform_2(%arg0: i32) -> (i32, i32) {
    %c0_i32 = arith.constant 0 : i32
    %c0_i32_0 = arith.constant 0 : i32
    %c0_i32_1 = arith.constant 0 : i32
    return %c0_i32, %c0_i32_0 : i32, i32
  }
  func.func @transform_3(%arg0: i32) -> (i32, i32, i32) {
    %c0_i32 = arith.constant 0 : i32
    %c0_i32_0 = arith.constant 0 : i32
    %c0_i32_1 = arith.constant 0 : i32
    return %arg0, %c0_i32, %c0_i32_0 : i32, i32, i32
  }
}

</mosaic_0001>

<bundles_post_ra>
// kernel: ece_loss.1
= control target key start
LH: loop header
LB: loop body
LE: loop exit
PB: predicated region body
PF: predicated region fallthrough
CT: control target
= control target key end

     0   :  { %vm30_vm0 = vcmask 130048   ;;  %v55_v16 = vlaneseq  ;;  %v420_v50 = vmov 0.0   ;;  %s752_s0 = inlined_call_operand.vmem [shape: f32[64,16], index: 0, kind: input, shape index: {}]   ;;  %s753_s2 = inlined_call_operand.vmem [shape: f32[2,16], index: 2, kind: input, shape index: {}]   ;;  %s754_s1 = inlined_call_operand.vmem [shape: s32[64,1], index: 1, kind: input, shape index: {}]   ;;  %s755_s3 = inlined_call_operand.vmem [shape: f32[1,3,16], index: 3, kind: output, shape index: {}]  }
   0x1   :  { %v14_v0 = vld [vmem:[%s752_s0] sm:$0xff]  ;;  %v16_v1 = vld [vmem:[%s752_s0 + $0x10] sm:$0xff]  ;;  %v15_v2 = vld [vmem:[%s752_s0 + $0x8] sm:$0xff] }
   0x2   :  { %v31_v3 = vsel %vm30_vm0, %v14_v0, -inf  ;;  %v37_v4 = vsel %vm30_vm0, %v16_v1, -inf  ;;  %v17_v5 = vld [vmem:[%s752_s0 + $0x18] sm:$0xff]  ;;  %v34_v6 = vsel %vm30_vm0, %v15_v2, -inf  ;;  %v18_v8 = vld [vmem:[%s752_s0 + $0x20] sm:$0xff]  ;;  %v19_v9 = vld [vmem:[%s752_s0 + $0x28] sm:$0xff] }
   0x3   :  { %32 = vmax.xlane.f32.xlu0 %v31_v3  ;;  %38 = vmax.xlane.f32.xlu1 %v37_v4  ;;  %v40_v7 = vsel %vm30_vm0, %v17_v5, -inf  ;;  %v43_v10 = vsel %vm30_vm0, %v18_v8, -inf  ;;  %v46_v11 = vsel %vm30_vm0, %v19_v9, -inf  ;;  %v469_v12 = vld [vmem:[%s752_s0 + $0x30] sm:$0xff]  ;;  %v474_v13 = vld [vmem:[%s752_s0 + $0x38] sm:$0xff]  ;;  %v219_v17 = vshrl.u32 %v55_v16, 7 }
   0x4   :  { %v49_v14 = vsel %vm30_vm0, %v469_v12, -inf  ;;  %v52_v15 = vsel %vm30_vm0, %v474_v13, -inf  ;;  %v217_v20 = vld [vmem:[%s753_s2] sm:$0x3]  ;;  %v56_v23 = vand.u32 127, %v55_v16 }
   0x5   :  { %v220_v18 = vsub.s32 0, %v219_v17  ;;  %v232_v19 = vsub.s32 1, %v219_v17 }
   0x7   :  { %35 = vmax.xlane.f32.xlu0 %v34_v6  ;;  %41 = vmax.xlane.f32.xlu1 %v40_v7  ;;  %v483_v21 = vrot.slane %v217_v20, %v220_v18  ;;  %v485_v22 = vrot.slane %v217_v20, %v232_v19 }
   0xb   :  { %44 = vmax.xlane.f32.xlu0 %v43_v10  ;;  %47 = vmax.xlane.f32.xlu1 %v46_v11 }
   0xf   :  { %50 = vmax.xlane.f32.xlu0 %v49_v14  ;;  %53 = vmax.xlane.f32.xlu1 %v52_v15 }
  0x90   :  { %v487_v24 = vpop.xlane.xlu0 %32  ;;  %v39_v25 = vpop.xlane.xlu1 %38 }
  0x91   :  { %vm222_vm1 = vcmp.gt.f32.partialorder %v487_v24, %v483_v21  ;;  %vm234_vm2 = vcmp.le.f32.partialorder %v487_v24, %v485_v22  ;;  %vm57_vm3 = vcmp.eq.f32.partialorder %v14_v0, %v487_v24  ;;  %vm59_vm4 = vcmp.eq.f32.partialorder %v16_v1, %v39_v25 }
  0x92   :  { %v65_v26 = vsel %vm57_vm3, %v56_v23, 16  ;;  %v67_v27 = vsel %vm59_vm4, %v56_v23, 16  ;;  %vm224_vm5 = vcmp.gt.f32.partialorder %v39_v25, %v483_v21  ;;  %vm236_vm6 = vcmp.le.f32.partialorder %v39_v25, %v485_v22  ;;  %vm496_vm7 = vmand %vm222_vm1, %vm234_vm2 }
  0x93   :  { %v501_v29 = vsel %vm30_vm0, %v65_v26, 2147483647  ;;  %v504_v30 = vsel %vm30_vm0, %v67_v27, 2147483647  ;;  %vm506_vm8 = vmand %vm224_vm5, %vm236_vm6  ;;  %v571_v60 = vsel %vm496_vm7, 1.0, %v420_v50 }
  0x94   :  { %v36_v32 = vpop.xlane.xlu0 %35  ;;  %v510_v33 = vpop.xlane.xlu1 %41  ;;  %v75_v34 = vshra.s32 %v501_v29, 16  ;;  %v105_v35 = vshra.s32 %v504_v30, 16  ;;  %v545_v51 = vsel %vm506_vm8, 1.0, %v420_v50  ;;  %v287_v7 = vmul.f32 %v571_v60, %v487_v24 }
  0x95   :  { %vm223_vm9 = vcmp.gt.f32.partialorder %v36_v32, %v483_v21  ;;  %vm235_vm10 = vcmp.le.f32.partialorder %v36_v32, %v485_v22  ;;  %vm58_vm11 = vcmp.eq.f32.partialorder %v15_v2, %v36_v32  ;;  %vm60_vm12 = vcmp.eq.f32.partialorder %v17_v5, %v510_v33 }
  0x96   :  { %v517_v36 = vcvt.s32.f32 %v75_v34  ;;  %v66_v37 = vsel %vm58_vm11, %v56_v23, 16  ;;  %v68_v38 = vsel %vm60_vm12, %v56_v23, 16  ;;  %vm519_vm13 = vmand %vm223_vm9, %vm235_vm10  ;;  %v534_v44 = vcvt.s32.f32 %v105_v35 }
  0x97   :  { %v524_v40 = vsel %vm30_vm0, %v66_v37, 2147483647  ;;  %v527_v41 = vsel %vm30_vm0, %v68_v38, 2147483647  ;;  %v289_v59 = vmul.f32 %v545_v51, %v39_v25  ;;  %v578_v0 = vsel %vm519_vm13, 1.0, %v420_v50 }
  0x98   :  { %78 = vmin.xlane.f32.xlu0 %v517_v36  ;;  %v530_v42 = vpop.xlane.xlu0 %44  ;;  %v532_v43 = vpop.xlane.xlu1 %47  ;;  %v90_v45 = vshra.s32 %v524_v40, 16  ;;  %v120_v46 = vshra.s32 %v527_v41, 16  ;;  %v267_v6 = vsel %vm30_vm0, %v578_v0, 0.0  ;;  %v266_v11 = vsel %vm30_vm0, %v571_v60, 0.0 }
  0x99   :  { %vm61_vm14 = vcmp.eq.f32.partialorder %v18_v8, %v530_v42  ;;  %vm62_vm15 = vcmp.eq.f32.partialorder %v19_v9, %v532_v43  ;;  %v269_v9 = vsel %vm30_vm0, %v545_v51, 0.0  ;;  %v298_v10 = vsel %vm30_vm0, %v289_v59, 0.0 }
  0x9a   :  { %v540_v47 = vcvt.s32.f32 %v90_v45  ;;  %v69_v48 = vsel %vm61_vm14, %v56_v23, 16  ;;  %v70_v49 = vsel %vm62_vm15, %v56_v23, 16  ;;  %v559_v56 = vcvt.s32.f32 %v120_v46 }
  0x9b   :  { %v548_v52 = vsel %vm30_vm0, %v69_v48, 2147483647  ;;  %v551_v53 = vsel %vm30_vm0, %v70_v49, 2147483647  ;;  %v288_v14 = vmul.f32 %v578_v0, %v36_v32  ;;  %vm225_vm3 = vcmp.gt.f32.partialorder %v510_v33, %v483_v21 }
  0x9c   :  { %108 = vmin.xlane.f32.xlu0 %v534_v44  ;;  %93 = vmin.xlane.f32.xlu1 %v540_v47  ;;  %v555_v54 = vpop.xlane.xlu0 %50  ;;  %v557_v55 = vpop.xlane.xlu1 %53  ;;  %v135_v57 = vshra.s32 %v548_v52, 16  ;;  %v150_v58 = vshra.s32 %v551_v53, 16  ;;  %v295_v15 = vsel %vm30_vm0, %v287_v7, 0.0  ;;  %vm237_vm4 = vcmp.le.f32.partialorder %v510_v33, %v485_v22 }
  0x9d   :  { %vm63_vm1 = vcmp.eq.f32.partialorder %v469_v12, %v555_v54  ;;  %vm64_vm2 = vcmp.eq.f32.partialorder %v474_v13, %v557_v55  ;;  %v268_v13 = vadd.f32 %v267_v6, %v266_v11  ;;  %vm226_vm5 = vcmp.gt.f32.partialorder %v530_v42, %v483_v21  ;;  %vm245_vm7 = vmand %vm225_vm3, %vm237_vm4 }
  0x9e   :  { %v573_v61 = vcvt.s32.f32 %v135_v57  ;;  %v71_v62 = vsel %vm63_vm1, %v56_v23, 16  ;;  %v72_v63 = vsel %vm64_vm2, %v56_v23, 16  ;;  %v588_v3 = vcvt.s32.f32 %v150_v58 }
  0x9f   :  { %v581_v1 = vsel %vm30_vm0, %v71_v62, 2147483647  ;;  %v584_v2 = vsel %vm30_vm0, %v72_v63, 2147483647  ;;  %vm238_vm6 = vcmp.le.f32.partialorder %v530_v42, %v485_v22  ;;  %v296_v16 = vsel %vm30_vm0, %v288_v14, 0.0 }
  0xa0   :  { %123 = vmin.xlane.f32.xlu1 %v559_v56  ;;  %138 = vmin.xlane.f32.xlu0 %v573_v61  ;;  %v165_v4 = vshra.s32 %v581_v1, 16  ;;  %v180_v5 = vshra.s32 %v584_v2, 16  ;;  %v270_v17 = vadd.f32 %v269_v9, %v268_v13  ;;  %vm227_vm8 = vcmp.gt.f32.partialorder %v532_v43, %v483_v21  ;;  %vm246_vm10 = vmand %vm226_vm5, %vm238_vm6 }
  0xa1   :  { %vm239_vm9 = vcmp.le.f32.partialorder %v532_v43, %v485_v22  ;;  %v297_v18 = vadd.f32 %v296_v16, %v295_v15  ;;  %v623_v19 = vsel %vm245_vm7, 1.0, %v420_v50  ;;  %vm228_vm11 = vcmp.gt.f32.partialorder %v555_v54, %v483_v21 }
  0xa2   :  { %v596_v8 = vcvt.s32.f32 %v165_v4  ;;  %v603_v12 = vcvt.s32.f32 %v180_v5  ;;  %vm240_vm12 = vcmp.le.f32.partialorder %v555_v54, %v485_v22  ;;  %v271_v20 = vsel %vm30_vm0, %v623_v19, 0.0  ;;  %vm247_vm13 = vmand %vm227_vm8, %vm239_vm9 }
  0xa3   :  { %v290_v23 = vmul.f32 %v623_v19, %v510_v33  ;;  %v634_v24 = vsel %vm246_vm10, 1.0, %v420_v50  ;;  %vm229_vm14 = vcmp.gt.f32.partialorder %v557_v55, %v483_v21  ;;  %v272_v25 = vadd.f32 %v271_v20, %v270_v17  ;;  %vm248_vm15 = vmand %vm228_vm11, %vm240_vm12 }
  0xa4   :  { %153 = vmin.xlane.f32.xlu1 %v588_v3  ;;  %168 = vmin.xlane.f32.xlu0 %v596_v8  ;;  %v299_v26 = vadd.f32 %v298_v10, %v297_v18  ;;  %v273_v27 = vsel %vm30_vm0, %v634_v24, 0.0  ;;  %v291_v28 = vmul.f32 %v634_v24, %v530_v42  ;;  %v645_v32 = vsel %vm247_vm13, 1.0, %v420_v50 }
  0xa5   :  { %v300_v31 = vsel %vm30_vm0, %v290_v23, 0.0  ;;  %v648_v33 = vsel %vm248_vm15, 1.0, %v420_v50  ;;  %vm241_vm1 = vcmp.le.f32.partialorder %v557_v55, %v485_v22  ;;  %v274_v35 = vadd.f32 %v273_v27, %v272_v25 }
  0xa6   :  { %v301_v34 = vadd.f32 %v300_v31, %v299_v26  ;;  %v302_v37 = vsel %vm30_vm0, %v291_v28, 0.0  ;;  %v275_v38 = vsel %vm30_vm0, %v645_v32, 0.0  ;;  %vm249_vm2 = vmand %vm229_vm14, %vm241_vm1  ;;  %v292_v39 = vmul.f32 %v645_v32, %v532_v43 }
  0xa7   :  { %v277_v42 = vsel %vm30_vm0, %v648_v33, 0.0  ;;  %v293_v22 = vmul.f32 %v648_v33, %v555_v54  ;;  %v665_v45 = vsel %vm249_vm2, 1.0, %v420_v50  ;;  %v276_v48 = vadd.f32 %v275_v38, %v274_v35 }
  0xa8   :  { %183 = vmin.xlane.f32.xlu1 %v603_v12  ;;  %v303_v46 = vadd.f32 %v302_v37, %v301_v34  ;;  %v294_v49 = vmul.f32 %v665_v45, %v557_v55  ;;  %v304_v21 = vsel %vm30_vm0, %v292_v39, 0.0  ;;  %v279_v43 = vsel %vm30_vm0, %v665_v45, 0.0 }
  0xa9   :  { %v306_v57 = vsel %vm30_vm0, %v293_v22, 0.0  ;;  %v278_v59 = vadd.f32 %v277_v42, %v276_v48  ;;  %vm385_vm3 = vcmask 1040384   ;;  %v74_v20 = vand.u32 65535, %v501_v29 }
  0xaa   :  { %v305_v58 = vadd.f32 %v304_v21, %v303_v46  ;;  %v308_v62 = vsel %vm30_vm0, %v294_v49, 0.0  ;;  %v89_v26 = vand.u32 65535, %v524_v40  ;;  %v104_v27 = vand.u32 65535, %v504_v30 }
  0xab   :  { %v280_v63 = vadd.f32 %v279_v43, %v278_v59  ;;  %v76_v25 = vcvt.s32.f32 %v74_v20  ;;  %v119_v38 = vand.u32 65535, %v527_v41  ;;  %v134_v39 = vand.u32 65535, %v548_v52 }
  0xac   :  { %v307_v54 = vadd.f32 %v306_v57, %v305_v58  ;;  %v91_v35 = vcvt.s32.f32 %v89_v26  ;;  %v106_v37 = vcvt.s32.f32 %v104_v27  ;;  %v149_v46 = vand.u32 65535, %v551_v53 }
  0xad   :  { %v281_v4 = vrot.slane %v280_v63, 4  ;;  %v121_v42 = vcvt.s32.f32 %v119_v38  ;;  %v136_v22 = vcvt.s32.f32 %v134_v39  ;;  %v164_v48 = vand.u32 65535, %v581_v1 }
  0xae   :  { %v309_v5 = vadd.f32 %v308_v62, %v307_v54  ;;  %v151_v49 = vcvt.s32.f32 %v149_v46  ;;  %v179_v57 = vand.u32 65535, %v584_v2  ;;  %v421_v58 = vmov 0  }
  0xaf   :  { %v282_v6 = vadd.f32 %v281_v4, %v280_v63  ;;  %v166_v21 = vcvt.s32.f32 %v164_v48  ;;  %419 = vset.pattern.permute.xlu1 %v421_v58  ;;  %413 = vset.pattern.permute.xlu0 %v421_v58 }
  0xb0   :  { %v310_v7 = vrot.slane %v309_v5, 4  ;;  %v181_v1 = vcvt.s32.f32 %v179_v57 }
  0xb1   :  { %v283_v9 = vrot.slane %v282_v6, 2 }
  0xb2   :  { %v311_v10 = vadd.f32 %v310_v7, %v309_v5 }
  0xb3   :  { %v284_v55 = vadd.f32 %v283_v9, %v282_v6  ;;  %v22_v6 = vld [vmem:[%s754_s1] sm:$0xff] }
  0xb4   :  { %v312_v11 = vrot.slane %v311_v10, 2 }
  0xb5   :  { %v285_v13 = vrot.slane %v284_v55, 1 }
  0xb6   :  { %v313_v14 = vadd.f32 %v312_v11, %v311_v10 }
  0xb7   :  { %v286_v16 = vadd.f32 %v285_v13, %v284_v55  ;;  %v23_v13 = vld [vmem:[%s754_s1 + $0x8] sm:$0xff] }
  0xb8   :  { %v314_v15 = vrot.slane %v313_v14, 1 }
  0xba   :  { %v315_v17 = vadd.f32 %v314_v15, %v313_v14  ;;  %v24_v14 = vld [vmem:[%s754_s1 + $0x10] sm:$0xff] }
  0xbc   :  { %v674_v18 = vsel %vm385_vm3, %v286_v16, %v315_v17 }
 0x125   :  { %v79_v23 = vpop.xlane.xlu0 %78 }
 0x126   :  { %vm80_vm4 = vcmp.eq.f32.partialorder %v517_v36, %v79_v23  ;;  %v85_v2 = vcvt.f32.s32 %v79_v23 }
 0x127   :  { %v81_v28 = vsel %vm80_vm4, %v76_v25, inf }
 0x128   :  { %82 = vmin.xlane.f32.xlu0 %v81_v28  ;;  %v86_v59 = vshll.u32 %v85_v2, 16 }
 0x129   :  { %v94_v31 = vpop.xlane.xlu1 %93  ;;  %v109_v34 = vpop.xlane.xlu0 %108 }
 0x12a   :  { %vm95_vm5 = vcmp.eq.f32.partialorder %v540_v47, %v94_v31  ;;  %vm110_vm6 = vcmp.eq.f32.partialorder %v534_v44, %v109_v34  ;;  %v100_v62 = vcvt.f32.s32 %v94_v31 }
 0x12b   :  { %v96_v29 = vsel %vm95_vm5, %v91_v35, inf  ;;  %v111_v40 = vsel %vm110_vm6, %v106_v37, inf  ;;  %v25_v37 = vld [vmem:[%s754_s1 + $0x18] sm:$0xff]  ;;  %vm387_vm5 = vcmask 1041408   ;;  %vm389_vm6 = vcmask 124928  }
 0x12c   :  { %97 = vmin.xlane.f32.xlu1 %v96_v29  ;;  %112 = vmin.xlane.f32.xlu0 %v111_v40  ;;  %v101_v9 = vshll.u32 %v100_v62, 16 }
 0x12d   :  { %v124_v30 = vpop.xlane.xlu1 %123  ;;  %v139_v36 = vpop.xlane.xlu0 %138 }
 0x12e   :  { %vm125_vm7 = vcmp.eq.f32.partialorder %v559_v56, %v124_v30  ;;  %vm140_vm8 = vcmp.eq.f32.partialorder %v573_v61, %v139_v36  ;;  %v130_v4 = vcvt.f32.s32 %v124_v30  ;;  %v145_v5 = vcvt.f32.s32 %v139_v36  ;;  %v26_v36 = vld [vmem:[%s754_s1 + $0x20] sm:$0xff] }
 0x12f   :  { %v126_v41 = vsel %vm125_vm7, %v121_v42, inf  ;;  %v141_v47 = vsel %vm140_vm8, %v136_v22, inf }
 0x130   :  { %127 = vmin.xlane.f32.xlu1 %v126_v41  ;;  %142 = vmin.xlane.f32.xlu0 %v141_v47  ;;  %v131_v17 = vshll.u32 %v130_v4, 16  ;;  %v146_v20 = vshll.u32 %v145_v5, 16 }
 0x131   :  { %v154_v44 = vpop.xlane.xlu1 %153  ;;  %v688_v52 = vpop.xlane.xlu0 %168 }
 0x132   :  { %vm155_vm9 = vcmp.eq.f32.partialorder %v588_v3, %v154_v44  ;;  %vm170_vm10 = vcmp.eq.f32.partialorder %v596_v8, %v688_v52  ;;  %v115_v8 = vcvt.f32.s32 %v109_v34  ;;  %v160_v23 = vcvt.f32.s32 %v154_v44 }
 0x133   :  { %v156_v53 = vsel %vm155_vm9, %v151_v49, inf  ;;  %v171_v56 = vsel %vm170_vm10, %v166_v21, inf  ;;  %v175_v22 = vcvt.f32.s32 %v688_v52  ;;  %v27_v49 = vld [vmem:[%s754_s1 + $0x28] sm:$0xff] }
 0x134   :  { %157 = vmin.xlane.f32.xlu1 %v156_v53  ;;  %172 = vmin.xlane.f32.xlu0 %v171_v56  ;;  %v116_v10 = vshll.u32 %v115_v8, 16  ;;  %v161_v42 = vshll.u32 %v160_v23, 16 }
 0x135   :  { %v694_v61 = vpop.xlane.xlu1 %183  ;;  %v176_v21 = vshll.u32 %v175_v22, 16 }
 0x136   :  { %vm185_vm11 = vcmp.eq.f32.partialorder %v603_v12, %v694_v61  ;;  %v190_v57 = vcvt.f32.s32 %v694_v61  ;;  %v29_v61 = vld [vmem:[%s754_s1 + $0x38] sm:$0xff] }
 0x137   :  { %v186_v43 = vsel %vm185_vm11, %v181_v1, inf  ;;  %v28_v1 = vld [vmem:[%s754_s1 + $0x30] sm:$0xff] }
 0x138   :  { %187 = vmin.xlane.f32.xlu1 %v186_v43  ;;  %v191_v43 = vshll.u32 %v190_v57, 16 }
 0x1b5   :  { %v83_v3 = vpop.xlane.xlu0 %82 }
 0x1b6   :  { %v84_v54 = vcvt.f32.s32 %v83_v3 }
 0x1b8   :  { %v87_v63 = vadd.s32 %v86_v59, %v84_v54 }
 0x1b9   :  { %v98_v7 = vpop.xlane.xlu1 %97  ;;  %v113_v12 = vpop.xlane.xlu0 %112 }
 0x1ba   :  { %v99_v55 = vcvt.f32.s32 %v98_v7  ;;  %v114_v11 = vcvt.f32.s32 %v113_v12  ;;  %vm193_vm12 = vcmp.eq.s32.totalorder %v87_v63, %v22_v6 }
 0x1bb   :  { %v395_v34 = vsel %vm193_vm12, 1.0, %v420_v50 }
 0x1bc   :  { %v102_v15 = vadd.s32 %v101_v9, %v99_v55  ;;  %v117_v16 = vadd.s32 %v116_v10, %v114_v11 }
 0x1bd   :  { %v128_v25 = vpop.xlane.xlu1 %127  ;;  %v143_v26 = vpop.xlane.xlu0 %142 }
 0x1be   :  { %vm194_vm13 = vcmp.eq.s32.totalorder %v102_v15, %v23_v13  ;;  %v129_v27 = vcvt.f32.s32 %v128_v25  ;;  %v144_v28 = vcvt.f32.s32 %v143_v26  ;;  %vm195_vm14 = vcmp.eq.s32.totalorder %v117_v16, %v24_v14 }
 0x1bf   :  { %v397_v31 = vsel %vm195_vm14, 1.0, %v420_v50  ;;  %v396_v35 = vsel %vm194_vm13, 1.0, %v420_v50 }
 0x1c0   :  { %v132_v38 = vadd.s32 %v131_v17, %v129_v27  ;;  %v147_v39 = vadd.s32 %v146_v20, %v144_v28  ;;  %328 = vperm.xlu1 %419, %v397_v31   ;;  %v414_v29 = vpack.i.bf16 %v396_v35, %v395_v34 }
 0x1c1   :  { %v158_v40 = vpop.xlane.xlu1 %157  ;;  %v173_v30 = vpop.xlane.xlu0 %172 }
 0x1c2   :  { %v159_v46 = vcvt.f32.s32 %v158_v40  ;;  %415 = vperm.xlu0 %413, %v414_v29   ;;  %vm196_vm15 = vcmp.eq.s32.totalorder %v132_v38, %v25_v37  ;;  %v174_v47 = vcvt.f32.s32 %v173_v30  ;;  %vm197_vm1 = vcmp.eq.s32.totalorder %v147_v39, %v26_v36 }
 0x1c3   :  { %v398_v48 = vsel %vm196_vm15, 1.0, %v420_v50  ;;  %v399_v53 = vsel %vm197_vm1, 1.0, %v420_v50 }
 0x1c4   :  { %v162_v41 = vadd.s32 %v161_v42, %v159_v46  ;;  %333 = vperm.xlu1 %419, %v398_v48   ;;  %v177_v52 = vadd.s32 %v176_v21, %v174_v47 }
 0x1c5   :  { %v188_v44 = vpop.xlane.xlu1 %187 }
 0x1c6   :  { %v189_v56 = vcvt.f32.s32 %v188_v44  ;;  %vm198_vm2 = vcmp.eq.s32.totalorder %v162_v41, %v27_v49  ;;  %vm199_vm3 = vcmp.eq.s32.totalorder %v177_v52, %v28_v1 }
 0x1c7   :  { %v400_v58 = vsel %vm198_vm2, 1.0, %v420_v50  ;;  %v401_v3 = vsel %vm199_vm3, 1.0, %v420_v50 }
 0x1c8   :  { %338 = vperm.xlu1 %419, %v399_v53   ;;  %v192_v2 = vadd.s32 %v191_v43, %v189_v56 }
 0x1ca   :  { %vm200_vm4 = vcmp.eq.s32.totalorder %v192_v2, %v29_v61 }
 0x1cb   :  { %v402_v59 = vsel %vm200_vm4, 1.0, %v420_v50 }
 0x1cc   :  { %343 = vperm.xlu1 %419, %v400_v58  }
 0x1d0   :  { %348 = vperm.xlu1 %419, %v401_v3  }
 0x1d4   :  { %353 = vperm.xlu1 %419, %v402_v59  }
 0x23f   :  { %v329_v62 = vpop.permute.xlu1 %328 }
 0x240   :  { %v358_v5 = vmul.f32 %v545_v51, %v329_v62 }
 0x241   :  { %v416_v8 = vpop.permute.xlu0 %415 }
 0x242   :  { %v418_v54 = vunpack.i.h.bf16 %v416_v8  ;;  %v417_v63 = vunpack.i.l.bf16 %v416_v8  ;;  %v367_v11 = vsel %vm30_vm0, %v358_v5, 0.0 }
 0x243   :  { %v334_v4 = vpop.permute.xlu1 %333 }
 0x244   :  { %v357_v6 = vmul.f32 %v418_v54, %v578_v0  ;;  %v356_v7 = vmul.f32 %v417_v63, %v571_v60  ;;  %v359_v10 = vmul.f32 %v623_v19, %v334_v4 }
 0x246   :  { %v365_v12 = vsel %vm30_vm0, %v357_v6, 0.0  ;;  %v364_v9 = vsel %vm30_vm0, %v356_v7, 0.0  ;;  %v369_v15 = vsel %vm30_vm0, %v359_v10, 0.0 }
 0x247   :  { %v366_v55 = vadd.f32 %v365_v12, %v364_v9  ;;  %v339_v50 = vpop.permute.xlu1 %338 }
 0x248   :  { %v360_v13 = vmul.f32 %v634_v24, %v339_v50 }
 0x249   :  { %v368_v14 = vadd.f32 %v367_v11, %v366_v55 }
 0x24a   :  { %v371_v0 = vsel %vm30_vm0, %v360_v13, 0.0 }
 0x24b   :  { %v370_v51 = vadd.f32 %v369_v15, %v368_v14  ;;  %v344_v16 = vpop.permute.xlu1 %343 }
 0x24c   :  { %v361_v60 = vmul.f32 %v645_v32, %v344_v16 }
 0x24d   :  { %v372_v17 = vadd.f32 %v371_v0, %v370_v51 }
 0x24e   :  { %v373_v20 = vsel %vm30_vm0, %v361_v60, 0.0 }
 0x24f   :  { %v374_v23 = vadd.f32 %v373_v20, %v372_v17  ;;  %v349_v19 = vpop.permute.xlu1 %348 }
 0x250   :  { %v362_v25 = vmul.f32 %v648_v33, %v349_v19 }
 0x252   :  { %v375_v26 = vsel %vm30_vm0, %v362_v25, 0.0 }
 0x253   :  { %v376_v27 = vadd.f32 %v375_v26, %v374_v23  ;;  %v354_v24 = vpop.permute.xlu1 %353 }
 0x254   :  { %v363_v28 = vmul.f32 %v665_v45, %v354_v24 }
 0x256   :  { %v377_v31 = vsel %vm30_vm0, %v363_v28, 0.0 }
 0x257   :  { %v378_v34 = vadd.f32 %v377_v31, %v376_v27 }
 0x259   :  { %v379_v35 = vrot.slane %v378_v34, 4 }
 0x25b   :  { %v380_v37 = vadd.f32 %v379_v35, %v378_v34 }
 0x25d   :  { %v381_v38 = vrot.slane %v380_v37, 2 }
 0x25f   :  { %v382_v32 = vadd.f32 %v381_v38, %v380_v37 }
 0x261   :  { %v383_v39 = vrot.slane %v382_v32, 1 }
 0x263   :  { %v384_v29 = vadd.f32 %v383_v39, %v382_v32 }
 0x265   :  { %v388_v40 = vsel %vm387_vm5, %v674_v18, %v384_v29 }
 0x266   :  { %390 = vst.msk [vmem:[%s755_s3] sm:$0x7] %vm389_vm6, %v388_v40 }

</bundles_post_ra>
